<compile_context>
chip_gen: v7x
topology: tpu7x:2x2x1
jax: 0.10.0
libtpu: 0.0.40
codegen_flags: <defaults>
</compile_context>

<pallas_src>
import functools

import jax
import jax.numpy as jnp
from jax import lax
from jax.experimental import pallas as pl
from jax.experimental.pallas import tpu as pltpu

BN_EPS = 1e-5
LANE = 128        # vreg lane width       -> feature-dim padding target
SUBLANE_BF16 = 16 # bf16 packed sublanes  -> batch-dim padding target


def _round_up(n, m):
    return ((n + m - 1) // m) * m


def _activation(name, x):
    if name == "sigmoid":
        return jax.nn.sigmoid(x)
    if name == "tanh":
        return jnp.tanh(x)
    if name == "leaky_relu":
        return jnp.where(x > 0, x, 0.01 * x)
    # default / 'relu' (mirrors get_activation_function fallback)
    return jnp.maximum(x, 0.0)


def _make_kernel(num_layers, activation_name, real_batch, pad_batch, h_pad):
    """Fused FFNN kernel body; one grid step per hidden layer (weights streamed)."""
    inv_b = 1.0 / float(real_batch)
    n_pad_rows = float(pad_batch - real_batch)

    def kernel(x_ref, w_ref, vec_ref, wout_ref, bout_ref, out_ref, h_ref):
        l = pl.program_id(0)

        # Prime the carried activation with the (zero-padded) input once.
        @pl.when(l == 0)
        def _():
            h_ref[...] = x_ref[...]

        h_in = h_ref[...]                 # f32 (Bp, Kp)
        w = w_ref[...]                    # bf16 (Kp, Hp) -- this layer's weight
        vec = vec_ref[...]                # f32  (3, Hp)
        b = vec[0:1, :]
        gamma = vec[1:2, :]
        beta = vec[2:3, :]

        # Linear on the MXU: bf16 x bf16 -> f32 accumulate.  Rows of w beyond the
        # real fan-in are zero, so any stale columns in the carried scratch are
        # harmless.
        z = jnp.dot(h_in.astype(jnp.bfloat16), w,
                    preferred_element_type=jnp.float32) + b

        # Activation (VPU / EUP).
        a = _activation(activation_name, z)

        # BatchNorm1d (training-mode batch stats) folded into an affine:
        #   scale = gamma * rsqrt(var + eps); shift = beta - mean * scale.
        # Exact two-pass statistics over the *real* rows only.  All padded rows
        # are the same constant row (zero padded inputs propagated through
        # row-independent ops), so their contribution is removed analytically
        # from the full-tile sums instead of a per-element row-mask select.
        sum_all = jnp.sum(a, axis=0, keepdims=True)
        if pad_batch != real_batch:
            c = a[pad_batch - 1:pad_batch, :]           # one padded (constant) row
            mean = (sum_all - n_pad_rows * c) * inv_b
        else:
            mean = sum_all * inv_b
        d = a - mean
        ss_all = jnp.sum(d * d, axis=0, keepdims=True)
        if pad_batch != real_batch:
            dc = c - mean
            var = jnp.maximum((ss_all - n_pad_rows * (dc * dc)) * inv_b, 0.0)
        else:
            var = jnp.maximum(ss_all * inv_b, 0.0)
        scale = gamma * lax.rsqrt(var + BN_EPS)         # padded gamma lanes are 0
        shift = beta - mean * scale                     # -> padded lanes end at 0
        h_new = a * scale + shift                       # (Bp, Hp)

        # Carry for the next layer (columns >= Hp in the scratch are covered by
        # zero weight rows, so only the first Hp columns need updating).
        h_ref[:, :h_pad] = h_new

        # Final Linear (no activation / no BN) on the last grid step.
        @pl.when(l == num_layers - 1)
        def _():
            out_ref[...] = (jnp.dot(h_new.astype(jnp.bfloat16), wout_ref[...],
                                    preferred_element_type=jnp.float32)
                            + bout_ref[...]).astype(out_ref.dtype)

    return kernel


def _vmem_limit_bytes(pad_b, k_pad, h_pad, c_pad):
    """Generation-aware VMEM budget: resident working set, capped below physical."""
    need = (2 * pad_b * k_pad * 4          # x (constant-index input, 2 bufs)
            + 2 * k_pad * h_pad * 2        # streamed layer weight, double-buffered
            + 2 * 3 * h_pad * 4            # streamed layer vectors
            + 2 * (h_pad * c_pad * 2 + c_pad * 4)   # final weight / bias
            + 2 * pad_b * c_pad * 4        # resident output
            + pad_b * k_pad * 4            # carried-h scratch
            + 8 * pad_b * max(k_pad, h_pad) * 4)    # activation temporaries
    try:
        cap = int(getattr(pltpu.get_tpu_info(), "vmem_capacity_bytes", 64 << 20))
    except Exception:                       # fall back to the smallest (v7x per-TC)
        cap = 64 << 20
    usable = cap - (16 << 20)               # leave compiler scratch / spill headroom
    return int(min(usable, max(32 << 20, 2 * need)))


def flexible_ffnn_forward(x, w_stack, vec_stack, w_out, b_out, *,
                          num_layers, activation_name, num_classes):
    """x: [B, input_size] f32.  Stacked / padded params from pack_params_for_kernel."""
    batch, feat = x.shape
    k_pad = int(w_stack.shape[1])           # max(F0_p, H_p)
    h_pad = int(w_stack.shape[2])
    c_pad = int(w_out.shape[1])
    pad_b = _round_up(batch, SUBLANE_BF16)

    # Lane-dense (and sublane-dense) input: zero-pad once outside the kernel.
    x_pad = jnp.zeros((pad_b, k_pad), jnp.float32).at[:batch, :feat].set(x)

    kernel = _make_kernel(num_layers, activation_name, batch, pad_b, h_pad)

    grid_spec = pltpu.PrefetchScalarGridSpec(
        num_scalar_prefetch=0,
        grid=(num_layers,),
        in_specs=[
            pl.BlockSpec((pad_b, k_pad), lambda l: (0, 0)),          # x (resident)
            pl.BlockSpec((None, k_pad, h_pad), lambda l: (l, 0, 0)), # layer weight
            pl.BlockSpec((None, 3, h_pad), lambda l: (l, 0, 0)),     # bias|gamma|beta
            pl.BlockSpec((h_pad, c_pad), lambda l: (0, 0)),          # final weight
            pl.BlockSpec((1, c_pad), lambda l: (0, 0)),              # final bias
        ],
        out_specs=pl.BlockSpec((pad_b, c_pad), lambda l: (0, 0)),    # resident output
        scratch_shapes=[pltpu.VMEM((pad_b, k_pad), jnp.float32)],    # carried h
    )

    out_pad = pl.pallas_call(
        kernel,
        out_shape=jax.ShapeDtypeStruct((pad_b, c_pad), jnp.float32),
        grid_spec=grid_spec,
        compiler_params=pltpu.CompilerParams(
            dimension_semantics=("arbitrary",),   # h is carried across layers
            vmem_limit_bytes=_vmem_limit_bytes(pad_b, k_pad, h_pad, c_pad)),
    )(x_pad, w_stack, vec_stack, w_out, b_out)

    # Slice the padded lanes / rows back off outside the kernel.
    return out_pad[:batch, :num_classes]


# ----------------------------- parameters ---------------------------------- #

def init_params(key, input_size, hidden_size, num_classes, num_layers):
    """Unpadded f32 params mimicking PyTorch Linear/BatchNorm1d defaults."""
    dims = [input_size] + [hidden_size] * num_layers

    def linear(key, fan_in, fan_out):
        k1, k2 = jax.random.split(key)
        bound = 1.0 / (float(fan_in) ** 0.5)
        w = jax.random.uniform(k1, (fan_in, fan_out), jnp.float32, -bound, bound)
        b = jax.random.uniform(k2, (fan_out,), jnp.float32, -bound, bound)
        return w, b

    layers = []
    for i in range(num_layers):
        key, sub = jax.random.split(key)
        w, b = linear(sub, dims[i], dims[i + 1])
        gamma = jnp.ones((dims[i + 1],), jnp.float32)    # BN weight
        beta = jnp.zeros((dims[i + 1],), jnp.float32)    # BN bias
        layers.append((w, b, gamma, beta))

    key, sub = jax.random.split(key)
    w_out, b_out = linear(sub, hidden_size, num_classes)
    return layers, (w_out, b_out)


def pack_params_for_kernel(layers, final, input_size, hidden_size, num_classes):
    """Zero-pad feature dims to 128, cast weights to bf16, and stack per-layer
    params so the kernel can stream them over a layer grid:
      w_stack   : (L, K_p, H_p) bf16   (layer 0 fan-in = input_size, rest = H)
      vec_stack : (L, 3, H_p)   f32    rows = (bias, gamma, beta)
      w_out     : (H_p, C_p)    bf16
      b_out     : (1, C_p)      f32
    Padded gamma lanes stay 0 so padded feature lanes are exactly 0 after BN."""
    num_layers = len(layers)
    f0_p = _round_up(input_size, LANE)
    h_p = _round_up(hidden_size, LANE)
    c_p = _round_up(num_classes, LANE)
    k_p = max(f0_p, h_p)

    w_stack = jnp.zeros((num_layers, k_p, h_p), jnp.float32)
    vec_stack = jnp.zeros((num_layers, 3, h_p), jnp.float32)
    for i, (w, b, gamma, beta) in enumerate(layers):
        fi, fo = w.shape
        w_stack = w_stack.at[i, :fi, :fo].set(w)
        vec_stack = (vec_stack
                     .at[i, 0, :fo].set(b)
                     .at[i, 1, :fo].set(gamma)
                     .at[i, 2, :fo].set(beta))
    w_stack = w_stack.astype(jnp.bfloat16)

    w_out, b_out = final
    fi, fo = w_out.shape
    w_op = (jnp.zeros((h_p, c_p), jnp.float32)
            .at[:fi, :fo].set(w_out).astype(jnp.bfloat16))
    b_op = jnp.zeros((1, c_p), jnp.float32).at[0, :fo].set(b_out)
    return w_stack, vec_stack, w_op, b_op


# ------------------------------ reference ----------------------------------- #

def reference_forward(x, layers, final, *, activation_name):
    """Pure-JAX reference (unpadded), mirroring the bf16-weight / f32-accumulate
    matmul precision used by the kernel and two-pass BN statistics."""
    h = x
    for (w, b, gamma, beta) in layers:
        h = jnp.dot(h.astype(jnp.bfloat16), w.astype(jnp.bfloat16),
                    preferred_element_type=jnp.float32) + b
        h = _activation(activation_name, h)
        mean = jnp.mean(h, axis=0, keepdims=True)
        var = jnp.mean((h - mean) ** 2, axis=0, keepdims=True)
        h = (h - mean) * lax.rsqrt(var + BN_EPS) * gamma + beta
    w_out, b_out = final
    return jnp.dot(h.astype(jnp.bfloat16), w_out.astype(jnp.bfloat16),
                   preferred_element_type=jnp.float32) + b_out


# -------------------------------- main -------------------------------------- #

if __name__ == "__main__":
    batch = 8
    input_size = 16
    hidden_size = 32
    num_classes = 8
    num_layers = 3
    activation_name = "relu"
    assert activation_name in ("relu", "sigmoid", "tanh", "leaky_relu")

    key = jax.random.PRNGKey(0)
    key, xk = jax.random.split(key)
    x = jax.random.normal(xk, (batch, input_size), jnp.float32)

    layers, final = init_params(key, input_size, hidden_size, num_classes,
                                num_layers)
    w_stack, vec_stack, w_out_p, b_out_p = pack_params_for_kernel(
        layers, final, input_size, hidden_size, num_classes)

    fwd = jax.jit(functools.partial(
        flexible_ffnn_forward, num_layers=num_layers,
        activation_name=activation_name, num_classes=num_classes))

    out = fwd(x, w_stack, vec_stack, w_out_p, b_out_p)
    jax.block_until_ready(out)

    ref = reference_forward(x, layers, final, activation_name=activation_name)
    assert out.shape == (batch, num_classes)
    err = float(jnp.max(jnp.abs(out - ref)))
    assert jnp.allclose(out, ref, atol=5e-3, rtol=5e-3), f"max abs err={err}"

    print("KERNEL_OK")
</pallas_src>

<mosaic_0001>
module attributes {stable_mosaic.version = 11 : i64} {
  func.func @kernel(%arg0: i32, %arg1: memref<16x128xf32, #tpu.memory_space<vmem>>, %arg2: memref<1x128x128xbf16, #tpu.memory_space<vmem>>, %arg3: memref<1x3x128xf32, #tpu.memory_space<vmem>>, %arg4: memref<128x128xbf16, #tpu.memory_space<vmem>>, %arg5: memref<1x128xf32, #tpu.memory_space<vmem>>, %arg6: memref<16x128xf32, #tpu.memory_space<vmem>>, %arg7: memref<16x128xf32, #tpu.memory_space<vmem>>) attributes {dimension_semantics = [#tpu.dimension_semantics<arbitrary>], iteration_bounds = array<i64: 3>, scalar_prefetch = 0 : i64, scratch_operands = 1 : i64, tpu.core_type = #tpu.core_type<tc>, window_params = [{pipeline_mode = #tpu.pipeline_mode<synchronous>, transform_indices = @transform_0, window_bounds = array<i64: 16, 128>}, {transform_indices = @transform_1, window_bounds = array<i64: 1, 128, 128>}, {transform_indices = @transform_2, window_bounds = array<i64: 1, 3, 128>}, {pipeline_mode = #tpu.pipeline_mode<synchronous>, transform_indices = @transform_3, window_bounds = array<i64: 128, 128>}, {pipeline_mode = #tpu.pipeline_mode<synchronous>, transform_indices = @transform_4, window_bounds = array<i64: 1, 128>}, {pipeline_mode = #tpu.pipeline_mode<synchronous>, transform_indices = @transform_5, window_bounds = array<i64: 16, 128>}]} {
    %c0_i32 = arith.constant 0 : i32
    %0 = arith.cmpi eq, %arg0, %c0_i32 : i32
    %1 = arith.extui %0 : i1 to i32
    %c0_i32_0 = arith.constant 0 : i32
    %2 = arith.cmpi ne, %1, %c0_i32_0 : i32
    scf.if %2 {
      %c0_20 = arith.constant 0 : index
      %c0_21 = arith.constant 0 : index
      %53 = vector.load %arg1[%c0_20, %c0_21] : memref<16x128xf32, #tpu.memory_space<vmem>>, vector<16x128xf32>
      %c0_22 = arith.constant 0 : index
      %c0_23 = arith.constant 0 : index
      %54 = vector.load %arg7[%c0_22, %c0_23] : memref<16x128xf32, #tpu.memory_space<vmem>>, vector<16x128xf32>
      tpu.vector_store %arg7[%c0_22, %c0_23], %53 {strides = array<i32>} : memref<16x128xf32, #tpu.memory_space<vmem>>, vector<16x128xf32>,
    } else {
    }
    %c0 = arith.constant 0 : index
    %c0_1 = arith.constant 0 : index
    %3 = vector.load %arg7[%c0, %c0_1] : memref<16x128xf32, #tpu.memory_space<vmem>>, vector<16x128xf32>
    %c0_2 = arith.constant 0 : index
    %c0_3 = arith.constant 0 : index
    %c0_4 = arith.constant 0 : index
    %4 = vector.load %arg2[%c0_2, %c0_3, %c0_4] : memref<1x128x128xbf16, #tpu.memory_space<vmem>>, vector<1x128x128xbf16>
    %5 = vector.shape_cast %4 : vector<1x128x128xbf16> to vector<128x128xbf16>
    %c0_5 = arith.constant 0 : index
    %c0_6 = arith.constant 0 : index
    %c0_7 = arith.constant 0 : index
    %6 = vector.load %arg3[%c0_5, %c0_6, %c0_7] : memref<1x3x128xf32, #tpu.memory_space<vmem>>, vector<1x3x128xf32>
    %7 = vector.shape_cast %6 : vector<1x3x128xf32> to vector<3x128xf32>
    %8 = vector.extract_strided_slice %7 {offsets = [0, 0], sizes = [1, 128], strides = [1, 1]} : vector<3x128xf32> to vector<1x128xf32>
    %9 = vector.extract_strided_slice %7 {offsets = [1, 0], sizes = [1, 128], strides = [1, 1]} : vector<3x128xf32> to vector<1x128xf32>
    %10 = vector.extract_strided_slice %7 {offsets = [2, 0], sizes = [1, 128], strides = [1, 1]} : vector<3x128xf32> to vector<1x128xf32>
    %11 = arith.truncf %3 : vector<16x128xf32> to vector<16x128xbf16>
    %cst = arith.constant dense<0.000000e+00> : vector<16x128xf32>
    %12 = tpu.matmul %11, %5, %cst {dimension_numbers = #tpu.dot_dimension_numbers<[1], [0], [0], [1], [0, 0, 1, 1], [], []>} : vector<16x128xbf16>, vector<128x128xbf16>, vector<16x128xf32> -> vector<16x128xf32>
    %13 = vector.broadcast %8 : vector<1x128xf32> to vector<16x128xf32>
    %14 = arith.addf %12, %13 : vector<16x128xf32>
    %cst_8 = arith.constant 0.000000e+00 : f32
    %15 = vector.broadcast %cst_8 : f32 to vector<16x128xf32>
    %16 = arith.maximumf %14, %15 : vector<16x128xf32>
    %cst_9 = arith.constant dense<0.000000e+00> : vector<128xf32>
    %17 = vector.multi_reduction <add>, %16, %cst_9 [0] : vector<16x128xf32> to vector<128xf32>
    %18 = vector.shape_cast %17 : vector<128xf32> to vector<1x128xf32>
    %19 = vector.extract_strided_slice %16 {offsets = [15, 0], sizes = [1, 128], strides = [1, 1]} : vector<16x128xf32> to vector<1x128xf32>
    %cst_10 = arith.constant 8.000000e+00 : f32
    %20 = vector.broadcast %cst_10 : f32 to vector<1x128xf32>
    %21 = arith.mulf %20, %19 : vector<1x128xf32>
    %22 = arith.subf %18, %21 : vector<1x128xf32>
    %cst_11 = arith.constant 1.250000e-01 : f32
    %23 = vector.broadcast %cst_11 : f32 to vector<1x128xf32>
    %24 = arith.mulf %22, %23 : vector<1x128xf32>
    %25 = vector.broadcast %24 : vector<1x128xf32> to vector<16x128xf32>
    %26 = arith.subf %16, %25 : vector<16x128xf32>
    %27 = arith.mulf %26, %26 : vector<16x128xf32>
    %cst_12 = arith.constant dense<0.000000e+00> : vector<128xf32>
    %28 = vector.multi_reduction <add>, %27, %cst_12 [0] : vector<16x128xf32> to vector<128xf32>
    %29 = vector.shape_cast %28 : vector<128xf32> to vector<1x128xf32>
    %30 = arith.subf %19, %24 : vector<1x128xf32>
    %31 = arith.mulf %30, %30 : vector<1x128xf32>
    %cst_13 = arith.constant 8.000000e+00 : f32
    %32 = vector.broadcast %cst_13 : f32 to vector<1x128xf32>
    %33 = arith.mulf %32, %31 : vector<1x128xf32>
    %34 = arith.subf %29, %33 : vector<1x128xf32>
    %cst_14 = arith.constant 1.250000e-01 : f32
    %35 = vector.broadcast %cst_14 : f32 to vector<1x128xf32>
    %36 = arith.mulf %34, %35 : vector<1x128xf32>
    %cst_15 = arith.constant 0.000000e+00 : f32
    %37 = vector.broadcast %cst_15 : f32 to vector<1x128xf32>
    %38 = arith.maximumf %36, %37 : vector<1x128xf32>
    %cst_16 = arith.constant 9.99999974E-6 : f32
    %39 = vector.broadcast %cst_16 : f32 to vector<1x128xf32>
    %40 = arith.addf %38, %39 : vector<1x128xf32>
    %41 = math.rsqrt %40 : vector<1x128xf32>
    %42 = arith.mulf %9, %41 : vector<1x128xf32>
    %43 = arith.mulf %24, %42 : vector<1x128xf32>
    %44 = arith.subf %10, %43 : vector<1x128xf32>
    %45 = vector.broadcast %42 : vector<1x128xf32> to vector<16x128xf32>
    %46 = arith.mulf %16, %45 : vector<16x128xf32>
    %47 = vector.broadcast %44 : vector<1x128xf32> to vector<16x128xf32>
    %48 = arith.addf %46, %47 : vector<16x128xf32>
    %c0_17 = arith.constant 0 : index
    %c0_18 = arith.constant 0 : index
    %49 = vector.load %arg7[%c0_17, %c0_18] : memref<16x128xf32, #tpu.memory_space<vmem>>, vector<16x128xf32>
    tpu.vector_store %arg7[%c0_17, %c0_18], %48 {strides = array<i32>} : memref<16x128xf32, #tpu.memory_space<vmem>>, vector<16x128xf32>,
    %c2_i32 = arith.constant 2 : i32
    %50 = arith.cmpi eq, %arg0, %c2_i32 : i32
    %51 = arith.extui %50 : i1 to i32
    %c0_i32_19 = arith.constant 0 : i32
    %52 = arith.cmpi ne, %51, %c0_i32_19 : i32
    scf.if %52 {
      %53 = arith.truncf %48 : vector<16x128xf32> to vector<16x128xbf16>
      %c0_20 = arith.constant 0 : index
      %c0_21 = arith.constant 0 : index
      %54 = vector.load %arg4[%c0_20, %c0_21] : memref<128x128xbf16, #tpu.memory_space<vmem>>, vector<128x128xbf16>
      %cst_22 = arith.constant dense<0.000000e+00> : vector<16x128xf32>
      %55 = tpu.matmul %53, %54, %cst_22 {dimension_numbers = #tpu.dot_dimension_numbers<[1], [0], [0], [1], [0, 0, 1, 1], [], []>} : vector<16x128xbf16>, vector<128x128xbf16>, vector<16x128xf32> -> vector<16x128xf32>
      %c0_23 = arith.constant 0 : index
      %c0_24 = arith.constant 0 : index
      %56 = vector.load %arg5[%c0_23, %c0_24] : memref<1x128xf32, #tpu.memory_space<vmem>>, vector<1x128xf32>
      %57 = vector.broadcast %56 : vector<1x128xf32> to vector<16x128xf32>
      %58 = arith.addf %55, %57 : vector<16x128xf32>
      %c0_25 = arith.constant 0 : index
      %c0_26 = arith.constant 0 : index
      %59 = vector.load %arg6[%c0_25, %c0_26] : memref<16x128xf32, #tpu.memory_space<vmem>>, vector<16x128xf32>
      tpu.vector_store %arg6[%c0_25, %c0_26], %58 {strides = array<i32>} : memref<16x128xf32, #tpu.memory_space<vmem>>, vector<16x128xf32>,
    } else {
    }
    return
  }
  func.func @transform_0(%arg0: i32) -> (i32, i32) {
    %c0_i32 = arith.constant 0 : i32
    %c0_i32_0 = arith.constant 0 : i32
    %c0_i32_1 = arith.constant 0 : i32
    return %c0_i32, %c0_i32_0 : i32, i32
  }
  func.func @transform_1(%arg0: i32) -> (i32, i32, i32) {
    %c0_i32 = arith.constant 0 : i32
    %c0_i32_0 = arith.constant 0 : i32
    %c0_i32_1 = arith.constant 0 : i32
    return %arg0, %c0_i32, %c0_i32_0 : i32, i32, i32
  }
  func.func @transform_2(%arg0: i32) -> (i32, i32, i32) {
    %c0_i32 = arith.constant 0 : i32
    %c0_i32_0 = arith.constant 0 : i32
    %c0_i32_1 = arith.constant 0 : i32
    return %arg0, %c0_i32, %c0_i32_0 : i32, i32, i32
  }
  func.func @transform_3(%arg0: i32) -> (i32, i32) {
    %c0_i32 = arith.constant 0 : i32
    %c0_i32_0 = arith.constant 0 : i32
    %c0_i32_1 = arith.constant 0 : i32
    return %c0_i32, %c0_i32_0 : i32, i32
  }
  func.func @transform_4(%arg0: i32) -> (i32, i32) {
    %c0_i32 = arith.constant 0 : i32
    %c0_i32_0 = arith.constant 0 : i32
    %c0_i32_1 = arith.constant 0 : i32
    return %c0_i32, %c0_i32_0 : i32, i32
  }
  func.func @transform_5(%arg0: i32) -> (i32, i32) {
    %c0_i32 = arith.constant 0 : i32
    %c0_i32_0 = arith.constant 0 : i32
    %c0_i32_1 = arith.constant 0 : i32
    return %c0_i32, %c0_i32_0 : i32, i32
  }
}

</mosaic_0001>

<bundles_post_ra>
// kernel: flexible_ffnn_forward.1
= control target key start
LH: loop header
LB: loop body
LE: loop exit
PB: predicated region body
PF: predicated region fallthrough
CT: control target
= control target key end

     0   :  { %10 = vsyncpa [#allocation4], 0  ;;  %s1106_s0 = inlined_call_operand.vmem [shape: f32[16,128], index: 0, kind: input, shape index: {}]   ;;  %s1107_s1 = inlined_call_operand.hbm [shape: bf16[3,128,128], index: 1, kind: input, shape index: {}]   ;;  %s1108_s2 = inlined_call_operand.vmem [shape: f32[3,3,128], index: 2, kind: input, shape index: {}]   ;;  %s1109_s3 = inlined_call_operand.hbm [shape: bf16[128,128], index: 3, kind: input, shape index: {}]   ;;  %s1110_s4 = inlined_call_operand.vmem [shape: f32[1,128], index: 4, kind: input, shape index: {}]   ;;  %s1111_s5 = inlined_call_operand.vmem [shape: f32[16,128], index: 5, kind: output, shape index: {}]  }
   0x1   :  { %12 = vsyncpa [#allocation4 + $0x1], 0 }
   0x2   :  { %13 = vsyncpa [#allocation6], 0  ;;  %s926_s18 = smov 0   ;;  %s928_s19 = smov 0  }
   0x3   :  { %s930_s20 = smov 0   ;;  %s932_s21 = smov 0  }
   0x4 LB: > { %s945_s22 = sadd.s32 4294967295, %s886_s21   ;;  %p60_p0 = scmp.ne.s32.totalorder %s878_s19, %s874_s18  ;;  %s886_s21 = sphi %s932_s21, %s1128_s21   ;;  %s882_s20 = sphi %s930_s20, %s1127_s20   ;;  %s878_s19 = sphi %s928_s19, %s1126_s19   ;;  %s874_s18 = sphi %s926_s18, %s1125_s18  }
   0x5   : > { %p1112_p1 = scmp.eq.s32.totalorder %s945_s22, 0  ;;  %p626_p2 = scmp.ge.s32.totalorder %s886_s21, 1 }
   0x6   : > { %p160_p3 = scmp.lt.s32.totalorder %s886_s21, 4  ;;  %s888_s25 = smov [#allocation5]  }
   0x7   : > { %p954_p5 = por %p1112_p1, %p60_p0  ;;  %s175_s26 = sshll.u32 %s888_s25, 4  ;;  %s176_s26 = int_to_ptr.vmem [resolvable:$true] %s175_s26 }
   0x8   : > { %p958_p6 = pnand %p626_p2, %p160_p3  ;;  %s971_s28 = sadd.s32 1, %s886_s21  }
   0x9   : > { %s1115_s23 = scalar_select %p954_p5, 1, 0 }
   0xa   : > { %s1116_s24 = scalar_select %p958_p6, 1, 0 }
   0xb   : > { %p722_p7 = pneg %p958_p6  ;;  %s47_s29 = sadd.s32 1, %s882_s20 }
   0xc   : > { %s44_s30 = ssub.s32 %s886_s21, %s971_s28  ;;  %s790_s8 = scalar_lea.hbm %s1109_s3, 1024 }
   0xd   : > { %p966_p8 = pnand %p722_p7, %p1112_p1  ;;  %p791_p9 = scmp.ne.s32.totalorder %s1109_s3, %s790_s8 }
   0xe   : > { %p797_p13 = scmp.lt.u32.totalorder %s790_s8, %s1109_s3 }
   0xf   : > { %p792_p10 = pneg %p966_p8 }
  0x11   : > { %p793_p11 = pnand %p792_p10, %p791_p9 }
  0x13   : > { %p794_p12 = pneg %p793_p11 }
  0x15   : > { %p799_p0 = pnand %p797_p13, %p794_p12 }
  0x17   : > { %802 = shalt.err (!%p799_p0)
}
  0x18   : > { %s803_s13 = scalar_lea.vmem %s176_s26, 1024  ;;  %p811_p4 = scmp.lt.s32.totalorder %s176_s26, %s176_s26 }
  0x19   : > { %p804_p2 = scmp.ne.s32.totalorder %s176_s26, %s803_s13  ;;  %p812_p1 = scmp.lt.s32.totalorder %s803_s13, %s803_s13 }
  0x1b   : > { %p806_p3 = pnand %p804_p2, %p792_p10  ;;  %p813_p5 = por %p812_p1, %p811_p4 }
  0x1d   : > { %p807_p7 = pneg %p806_p3 }
  0x1f   : > { %p814_p6 = pnand %p813_p5, %p807_p7 }
  0x21   : > { %817 = shalt.err (!%p814_p6)
}
  0x22   : > { %s889_s14 = smov 64   ;;  %s890_s15 = smov 4  }
  0x23   : > { %725 = dma.hbm_to_vmem [thread:$0]  (!%p966_p8), %s1109_s3, 1024, %s176_s26, [#allocation6], %s889_s14, %s889_s14, %s890_s15  }
  0x24   : > { %p45_p1 = scmp.eq.s32.totalorder %s44_s30, 0  ;;  %p54_p4 = scmp.ne.s32.totalorder %s882_s20, %s878_s19 }
  0x25   : > { %p55_p5 = scmp.eq.s32.totalorder %s886_s21, 0  ;;  %p731_p6 = scmp.lt.s32.totalorder %s886_s21, 3 }
  0x26   : > { %s1000_s18 = scalar_select %p45_p1, %s882_s20, %s47_s29  }
  0x27   : > { %p56_p9 = por %p55_p5, %p54_p4  ;;  %s192_s25 = sand.u32 1, %s882_s20  }
  0x28   : > { %s629_s6 = sshll.u32 %s192_s25, 6  ;;  %s657_s7 = sshll.u32 %s886_s21, 10 }
  0x29   : > { %s1007_s27 = scalar_lea.hbm %s1107_s1, %s657_s7  ;;  %s196_s26 = scalar_lea.vmem [#allocation3], %s629_s6 }
  0x2a   : > { %s203_s30 = sshll.u32 %s196_s26, 4  ;;  %p1011_p8 = pnand %p731_p6, %p56_p9  ;;  %s1009_s30 = int_to_ptr.vmem [resolvable:$true] %s203_s30 }
  0x2b   : > { %s1015_s21 = scalar_lea.sflag [#allocation4], %s192_s25  ;;  %s818_s10 = scalar_lea.hbm %s1007_s27, 1024 }
  0x2c   : > { %p819_p10 = scmp.ne.s32.totalorder %s1007_s27, %s818_s10  ;;  %p820_p11 = pneg %p1011_p8 }
  0x2d   : > { %s823_s13 = scalar_lea.hbm %s1107_s1, 3072  ;;  %p824_p0 = scmp.lt.u32.totalorder %s1007_s27, %s1107_s1 }
  0x2e   : > { %p821_p12 = pnand %p820_p11, %p819_p10  ;;  %p825_p2 = scmp.lt.u32.totalorder %s823_s13, %s818_s10 }
  0x2f   : > { %p827_p7 = scmp.lt.u32.totalorder %s818_s10, %s1007_s27 }
  0x30   : > { %p822_p13 = pneg %p821_p12  ;;  %p826_p3 = por %p825_p2, %p824_p0 }
  0x32   : > { %p828_p1 = por %p827_p7, %p826_p3 }
  0x34   : > { %p829_p4 = pnand %p828_p1, %p822_p13 }
  0x36   : > { %832 = shalt.err (!%p829_p4)
}
  0x37   : > { %s833_s25 = scalar_lea.vmem %s1009_s30, 1024  ;;  %s891_s6 = smov [#allocation3]  }
  0x38   : > { %p834_p5 = scmp.ne.s32.totalorder %s1009_s30, %s833_s25  ;;  %s838_s7 = sshll.u32 %s891_s6, 4  ;;  %s839_s7 = int_to_ptr.vmem [resolvable:$false] %s838_s7 }
  0x39   : > { %s840_s8 = scalar_lea.vmem %s839_s7, 2048  ;;  %p841_p10 = scmp.lt.s32.totalorder %s1009_s30, %s839_s7 }
  0x3a   : > { %p836_p6 = pnand %p834_p5, %p820_p11  ;;  %p842_p12 = scmp.lt.s32.totalorder %s840_s8, %s833_s25 }
  0x3c   : > { %p837_p9 = pneg %p836_p6  ;;  %p843_p0 = por %p842_p12, %p841_p10 }
  0x3e   : > { %p844_p2 = pnand %p843_p0, %p837_p9 }
  0x40   : > { %847 = shalt.err (!%p844_p2)
}
  0x41   : > { %729 = dma.hbm_to_vmem [thread:$0]  (!%p1011_p8), %s1007_s27, 1024, %s1009_s30, %s1015_s21, %s889_s14, %s889_s14, %s890_s15  }
  0x42   : > { %p1119_p11 = scmp.ne.s32.totalorder %s1116_s24, 0 }
  0x43   : > { %s224_s9 = sand.u32 (!%p1119_p11), 1, %s878_s19   ;;  %p1120_p13 = scmp.ne.s32.totalorder (!%p1119_p11), %s1115_s23, 0 }
  0x44   : > { %222 = sbr.rel (%p1119_p11) target bundleno = 632 (0x278), region = 40  ;;  %s633_s26 = sshll.u32 (!%p1119_p11), %s224_s9, 6 }
  0x45   : > { %s225_s10 = scalar_lea.sflag (!%p1119_p11), [#allocation4], %s224_s9  ;;  %s1049_s11 = scalar_lea.vmem (!%p1119_p11), [#allocation3], %s633_s26 }
  0x4b   : > { %865 = dma.done.wait (%p1120_p13), %s225_s10, 1024  }
  0x4c   : > { %867 = vsyncadd (%p1120_p13), %s225_s10, 4294966272  ;;  %p1121_p3 = scmp.eq.s32.totalorder %s945_s22, 0 }
  0x4e   : > { %869 = dma.done.wait (%p1121_p3), [#allocation6], 1024   ;;  %p1122_p8 = pmov %p1121_p3 }
  0x4f   : > { %p258_p7 = scmp.lt.s32.totalorder %s945_s22, 2  ;;  %p1123_p1 = scmp.ne.s32.totalorder %s945_s22, 0 }
  0x50   : > { %871 = vsyncadd (%p1122_p8), [#allocation6], 4294966272  ;;  %v267_v0 = vld [vmem:[%s1106_s0] sm:$0xff] (!%p1123_p1)  ;;  %v268_v1 = vld [vmem:[%s1106_s0 + $0x8] sm:$0xff] (!%p1123_p1) }
  0x51   : > { %s259_s24 = scalar_select %p258_p7, %s945_s22, 2 }
  0x52   : > { %266 = sbr.rel (%p1123_p1) target bundleno = 89 (0x59), region = 52  ;;  %269 = vst [vmem:[#allocation2] sm:$0xff] (!%p1123_p1), %v267_v0  ;;  %270 = vst [vmem:[#allocation2 + $0x8] sm:$0xff] (!%p1123_p1), %v268_v1 }
  0x53   : > { %s635_s14 = sshll.u32 %s259_s24, 2 }
  0x54   : > { %s1064_s30 = scalar_lea.vmem %s1108_s2, %s635_s14 }
  0x59 PF: > { %v772_v2 = vld [vmem:[%s1049_s11] sm:$0xff]   ;;  %v892_v3 = vmov 0.0   ;;  %v773_v4 = vld [vmem:[%s1049_s11 + $0x8] sm:$0xff]   ;;  %vm893_vm0 = vmmov 0   ;;  %v774_v5 = vld [vmem:[%s1049_s11 + $0x10] sm:$0xff]   ;;  %v291_v14 = vlaneseq  ;;  %p645_p4 = scmp.ne.s32.totalorder %s945_s22, 2 }
  0x5a   : > { %676 = vmatprep.subr.bf16.mxu0 %v892_v3  ;;  %692 = vmatprep.mubr.msk.bf16.mxu0 %vm893_vm0, %v892_v3  ;;  %v775_v6 = vld [vmem:[%s1049_s11 + $0x18] sm:$0xff]   ;;  %v776_v7 = vld [vmem:[%s1049_s11 + $0x20] sm:$0xff]   ;;  %v777_v8 = vld [vmem:[%s1049_s11 + $0x28] sm:$0xff]   ;;  %vm895_vm1 = vmmov (!%p645_p4), 0  }
  0x5b   : > { %677 = vmatpush3.bf16.msra.mxu0 %v772_v2  ;;  %v778_v9 = vld [vmem:[%s1049_s11 + $0x30] sm:$0xff]   ;;  %v779_v10 = vld [vmem:[%s1049_s11 + $0x38] sm:$0xff]   ;;  %v292_v15 = vshrl.u32 %v291_v14, 7  ;;  %v787_v14 = vld [vmem:[#allocation5 + $0x28] sm:$0xff] (!%p645_p4)  }
  0x5c   : > { %678 = vmatprep.subr.bf16.mxu0 %v892_v3  ;;  %v271_v11 = vld [vmem:[#allocation2] sm:$0xff]  ;;  %v272_v12 = vld [vmem:[#allocation2 + $0x8] sm:$0xff] }
  0x5d   : > { %v290_v13 = vpack.c.bf16 %v272_v12, %v271_v11  ;;  %v293_v16 = vsub.s32 0, %v292_v15  ;;  %v289_v17 = vld [vmem:[%s1064_s30] sm:$0x7]  ;;  %v398_v36 = vsub.s32 7, %v292_v15  ;;  %v433_v59 = vsub.s32 1, %v292_v15  ;;  %v785_v12 = vld [vmem:[#allocation5 + $0x18] sm:$0xff] (!%p645_p4)  }
  0x5e   : > { %v784_v11 = vld [vmem:[#allocation5 + $0x10] sm:$0xff] (!%p645_p4)  }
  0x5f   : > { %679 = vmatpush3.bf16.msra.mxu0 %v773_v4  ;;  %v294_v18 = vrot.slane %v289_v17, %v293_v16  ;;  %v789_v16 = vld [vmem:[#allocation5 + $0x38] sm:$0xff] (!%p645_p4)  }
  0x60   : > { %680 = vmatprep.subr.bf16.mxu0 %v892_v3 }
  0x63   : > { %681 = vmatpush3.bf16.msra.mxu0 %v774_v5 }
  0x64   : > { %682 = vmatprep.subr.bf16.mxu0 %v892_v3 }
  0x67   : > { %683 = vmatpush3.bf16.msra.mxu0 %v775_v6 }
  0x68   : > { %684 = vmatprep.subr.bf16.mxu0 %v892_v3 }
  0x6b   : > { %685 = vmatpush3.bf16.msra.mxu0 %v776_v7 }
  0x6c   : > { %686 = vmatprep.subr.bf16.mxu0 %v892_v3 }
  0x6f   : > { %687 = vmatpush3.bf16.msra.mxu0 %v777_v8  ;;  %v782_v8 = vld [vmem:[#allocation5] sm:$0xff] (!%p645_p4)  }
  0x70   : > { %688 = vmatprep.subr.bf16.mxu0 %v892_v3 }
  0x73   : > { %689 = vmatpush3.bf16.msra.mxu0 %v778_v9  ;;  %v894_v9 = vmov (!%p645_p4), 0.0  }
  0x74   : > { %690 = vmatprep.subr.bf16.mxu0 %v892_v3  ;;  %v439_v3 = vsub.s32 2, %v292_v15  ;;  %v788_v15 = vld [vmem:[#allocation5 + $0x30] sm:$0xff] (!%p645_p4)  }
  0x77   : > { %691 = vmatpush3.bf16.msra.mxu0 %v779_v10  ;;  %v783_v10 = vld [vmem:[#allocation5 + $0x8] sm:$0xff] (!%p645_p4)  }
  0x78   : > { %696 = vmatprep.subr.bf16.mxu0 (!%p645_p4), %v894_v9 }
  0x7a   : > { %693 = vmatmul.mubr.bf16.vlgmr.msra.gmra.mrb[0].mxu0 %v290_v13  ;;  %v786_v13 = vld [vmem:[#allocation5 + $0x20] sm:$0xff] (!%p645_p4)  }
  0x7b   : > { %697 = vmatpush3.bf16.msra.mxu0 (!%p645_p4), %v782_v8  ;;  %712 = vmatprep.mubr.msk.bf16.mxu0 (!%p645_p4), %vm895_vm1, %v894_v9 }
  0x7c   : > { %698 = vmatprep.subr.bf16.mxu0 (!%p645_p4), %v894_v9 }
  0x7f   : > { %699 = vmatpush3.bf16.msra.mxu0 (!%p645_p4), %v783_v10 }
  0x80   : > { %700 = vmatprep.subr.bf16.mxu0 (!%p645_p4), %v894_v9 }
  0x83   : > { %701 = vmatpush3.bf16.msra.mxu0 (!%p645_p4), %v784_v11 }
  0x84   : > { %702 = vmatprep.subr.bf16.mxu0 (!%p645_p4), %v894_v9 }
  0x87   : > { %703 = vmatpush3.bf16.msra.mxu0 (!%p645_p4), %v785_v12 }
  0x88   : > { %704 = vmatprep.subr.bf16.mxu0 (!%p645_p4), %v894_v9 }
  0x8b   : > { %705 = vmatpush3.bf16.msra.mxu0 (!%p645_p4), %v786_v13 }
  0x8c   : > { %706 = vmatprep.subr.bf16.mxu0 (!%p645_p4), %v894_v9 }
  0x8f   : > { %707 = vmatpush3.bf16.msra.mxu0 (!%p645_p4), %v787_v14 }
  0x90   : > { %708 = vmatprep.subr.bf16.mxu0 (!%p645_p4), %v894_v9 }
  0x93   : > { %709 = vmatpush3.bf16.msra.mxu0 (!%p645_p4), %v788_v15 }
  0x94   : > { %710 = vmatprep.subr.bf16.mxu0 (!%p645_p4), %v894_v9 }
  0x97   : > { %711 = vmatpush3.bf16.msra.mxu0 (!%p645_p4), %v789_v16 }
 0x14d   : > { %v377_v19 = vpop.f32.mrb[0].mxu0 }
 0x14e   : > { %v378_v20 = vadd.f32 %v377_v19, %v294_v18  ;;  %v694_v21 = vpop.f32.mrb[1].mxu0 }
 0x14f   : > { %v380_v22 = vpop.f32.mrb[2].mxu0 }
 0x150   : > { %v381_v23 = vadd.f32 %v380_v22, %v294_v18  ;;  %v695_v24 = vpop.f32.mrb[3].mxu0  ;;  %v384_v25 = vmax.f32 %v378_v20, 0.0  ;;  %v646_v18 = vld [vmem:[%s1110_s4] ss:$0 sm:$0xff] (!%p645_p4) }
 0x152   : > { %v385_v26 = vmax.f32 %v381_v23, 0.0 }
 0x154   : > { %v386_v27 = vadd.f32 %v385_v26, %v384_v25  ;;  %v393_v34 = vmul.f32 8.0, %v385_v26 }
 0x156   : > { %v387_v28 = vrot.slane %v386_v27, 4 }
 0x158   : > { %v388_v29 = vadd.f32 %v387_v28, %v386_v27 }
 0x15a   : > { %v389_v30 = vrot.slane %v388_v29, 2 }
 0x15c   : > { %v390_v31 = vadd.f32 %v389_v30, %v388_v29 }
 0x15e   : > { %v391_v32 = vrot.slane %v390_v31, 1 }
 0x160   : > { %v392_v33 = vadd.f32 %v391_v32, %v390_v31 }
 0x162   : > { %v394_v35 = vsub.f32 %v392_v33, %v393_v34 }
 0x164   : > { %v395_v37 = vmul.f32 0.125, %v394_v35 }
 0x166   : > { %v399_v38 = vrot.slane %v395_v37, %v398_v36  ;;  %v411_v39 = vsub.f32 %v385_v26, %v395_v37 }
 0x168   : > { %v400_v40 = vsub.f32 %v384_v25, %v399_v38  ;;  %v401_v41 = vsub.f32 %v385_v26, %v399_v38  ;;  %v412_v49 = vmul.f32 %v411_v39, %v411_v39 }
 0x16a   : > { %v402_v42 = vmul.f32 %v400_v40, %v400_v40  ;;  %v403_v43 = vmul.f32 %v401_v41, %v401_v41  ;;  %v413_v52 = vmul.f32 8.0, %v412_v49 }
 0x16c   : > { %v404_v44 = vadd.f32 %v403_v43, %v402_v42 }
 0x16e   : > { %v405_v45 = vrot.slane %v404_v44, 4 }
 0x170   : > { %v406_v46 = vadd.f32 %v405_v45, %v404_v44 }
 0x172   : > { %v407_v47 = vrot.slane %v406_v46, 2 }
 0x174   : > { %v408_v48 = vadd.f32 %v407_v47, %v406_v46 }
 0x176   : > { %v409_v50 = vrot.slane %v408_v48, 1 }
 0x178   : > { %v410_v51 = vadd.f32 %v409_v50, %v408_v48 }
 0x17a   : > { %v414_v53 = vsub.f32 %v410_v51, %v413_v52 }
 0x17c   : > { %v415_v54 = vmul.f32 0.125, %v414_v53 }
 0x17e   : > { %v416_v55 = vmax.f32 %v415_v54, 0.0 }
 0x180   : > { %v417_v56 = vadd.f32 1e-05, %v416_v55 }
 0x182   : > { %780 = vrsqrt.f32 %v417_v56 }
 0x18c   : > { %v781_v57 = vpop.eup %780 }
 0x18d   : > { %v420_v58 = vrot.slane %v781_v57, 6 }
 0x18f   : > { %v422_v60 = vmul.f32 %v420_v58, %v289_v17 }
 0x191   : > { %v424_v61 = vrot.slane %v422_v60, 2  ;;  %v434_v62 = vrot.slane %v422_v60, %v433_v59 }
 0x193   : > { %v426_v63 = vmul.f32 %v424_v61, %v395_v37  ;;  %v435_v0 = vmul.f32 %v434_v62, %v384_v25  ;;  %v436_v1 = vmul.f32 %v434_v62, %v385_v26 }
 0x195   : > { %v428_v2 = vrot.slane %v426_v63, 5 }
 0x197   : > { %v430_v4 = vsub.f32 %v289_v17, %v428_v2  ;;  %448 = sbr.rel (%p645_p4) target bundleno = 632 (0x278), region = 56 }
 0x199   : > { %v440_v5 = vrot.slane %v430_v4, %v439_v3 }
 0x19b   : > { %v441_v6 = vadd.f32 %v440_v5, %v435_v0  ;;  %v442_v7 = vadd.f32 %v440_v5, %v436_v1 }
 0x19d   : > { %443 = vst [vmem:[#allocation2] sm:$0xff] %v441_v6  ;;  %444 = vst [vmem:[#allocation2 + $0x8] sm:$0xff] %v442_v7  ;;  %v449_v17 = vpack.c.bf16 (!%p645_p4), %v442_v7, %v441_v6 }
 0x19f   : > { %713 = vmatmul.mubr.bf16.vlgmr.msra.gmra.mrb[0].mxu0 %v449_v17 }
 0x272   : > { %v555_v19 = vpop.f32.mrb[0].mxu0 }
 0x273   : > { %v556_v20 = vadd.f32 %v646_v18, %v555_v19  ;;  %v714_v21 = vpop.f32.mrb[1].mxu0 }
 0x274   : > { %v558_v22 = vpop.f32.mrb[2].mxu0 }
 0x275   : > { %562 = vst [vmem:[%s1111_s5] sm:$0xff] %v556_v20  ;;  %v559_v23 = vadd.f32 %v646_v18, %v558_v22  ;;  %v715_v24 = vpop.f32.mrb[3].mxu0 }
 0x277   : > { %563 = vst [vmem:[%s1111_s5 + $0x8] sm:$0xff] %v559_v23 }
 0x278 PF: > { %s1124_s7 = smov %s1000_s18  ;;  %p16_p5 = scmp.ge.s32.totalorder %s971_s28, 5  }
 0x279   : > { %s1125_s18 = smov %s878_s19  ;;  %s1126_s19 = smov %s882_s20 }
 0x27a   : > { %s1127_s20 = smov %s1124_s7  ;;  %s1128_s21 = smov %s971_s28 }
 0x27b   :  { %18 = sbr.rel (!%p16_p5) target bundleno = 4 (0x4), region = 91 }
 0x282   :  { %575 = vsyncpa [#allocation4], 1 }
 0x283   :  { %577 = vsyncpa [#allocation4 + $0x1], 1 }
 0x284   :  { %578 = vsyncpa [#allocation6], 1 }

</bundles_post_ra>
